<compile_context>
chip_gen: v5e
topology: v5e:2x2
jax: 0.10.0
libtpu: 0.0.40
codegen_flags: <defaults>
</compile_context>

<pallas_src>
import functools

import jax
import jax.numpy as jnp
from jax.experimental import pallas as pl
from jax.experimental.pallas import tpu as pltpu


def _round_up(x, m):
    return ((x + m - 1) // m) * m


def _focal_loss_kernel(*refs, gamma, n_valid, tile_n, tiles_per_split,
                       needs_mask, has_alpha):
    if has_alpha:
        predict_ref, target_ref, alpha_ref, out_ref, acc_ref = refs
    else:
        predict_ref, target_ref, out_ref, acc_ref = refs
        alpha_ref = None

    s = pl.program_id(0)          # core-split axis ("parallel")
    t = pl.program_id(1)          # batch-tile reduction axis ("arbitrary")

    @pl.when(t == 0)
    def _():
        acc_ref[...] = jnp.zeros_like(acc_ref)

    x = predict_ref[...].astype(jnp.float32)      # (C, TILE_N) logits
    tgt = target_ref[...]                         # (1, TILE_N) int32 labels
    c, tn = x.shape

    # one_hot(target) with classes on the sublane axis (2-D iota on TPU).
    class_ids = jax.lax.broadcasted_iota(jnp.int32, (c, tn), 0)
    class_mask = (class_ids == tgt).astype(jnp.float32)          # (C, TILE_N)

    # log-softmax over the class (sublane) axis -> true-class log prob.
    m = jnp.max(x, axis=0, keepdims=True)                        # (1, TILE_N)
    lse = m + jnp.log(jnp.sum(jnp.exp(x - m), axis=0, keepdims=True))
    x_true = jnp.sum(x * class_mask, axis=0, keepdims=True)      # true-class logit
    log_p = x_true - lse                                         # finite, no underflow
    probs = jnp.exp(log_p)

    q = 1.0 - probs
    g = float(gamma)
    if g == 2.0:
        focal = q * q                       # VPU multiplies; no EUP pow
    elif g == int(g) and g >= 0.0:
        focal = jnp.ones_like(q)
        for _ in range(int(g)):
            focal = focal * q
    else:
        focal = jnp.power(q, jnp.float32(g))

    loss = -focal * log_p                                        # (1, TILE_N)

    if has_alpha:
        a = alpha_ref[...]                                       # (C, 1)
        alpha_per_sample = jnp.sum(class_mask * a, axis=0, keepdims=True)
        loss = loss * alpha_per_sample

    if needs_mask:
        # Mask out padded samples (only emitted when padding exists).
        lane = jax.lax.broadcasted_iota(jnp.int32, (1, tn), 1)
        sample = (s * tiles_per_split + t) * tile_n + lane
        loss = jnp.where(sample < n_valid, loss, 0.0)

    acc_ref[...] += jnp.sum(loss, axis=1, keepdims=True)         # running sum

    @pl.when(t == pl.num_programs(1) - 1)
    def _():
        out_ref[...] = jnp.broadcast_to(acc_ref[...], out_ref.shape)


def multi_ce_focal_loss(predict, target, alpha=None, gamma=2.0,
                        reduction="mean", block_n=None):
    """predict: (N, C) float, target: (N,) int -> scalar f32 focal loss."""
    n, c = predict.shape

    # Lane-dense layout: classes -> sublanes, batch -> 128 lanes. Keep the
    # original dtype for the DMA (e.g. bf16 logits); cast to f32 in-kernel.
    predict_t = predict.T                               # (C, N)
    target2d = target.reshape(1, n).astype(jnp.int32)   # (1, N)

    # Batch tile: ~2 MiB of f32 temporaries per tile, capped so the per-step
    # pipeline overhead (~0.35us) stays small vs DMA time at large N while
    # staying far under the scoped-VMEM limit.
    if block_n is not None:
        tile_n = _round_up(int(block_n), 128)
    else:
        budget = 2 * 1024 * 1024
        tile_n = max(128, (budget // (c * 4)) // 128 * 128)
        tile_n = min(tile_n, 32768, _round_up(n, 128))

    total_tiles = -(-n // tile_n)
    # Leading "parallel" axis: splits the batch loop across both TensorCores
    # on v7x; plain (near-free) outer loop on single-core v5e/v6e.
    num_splits = 2 if total_tiles >= 2 else 1
    tiles_per_split = -(-total_tiles // num_splits)
    n_pad = num_splits * tiles_per_split * tile_n
    needs_mask = n_pad != n
    if needs_mask:
        predict_t = jnp.pad(predict_t, ((0, 0), (0, n_pad - n)))
        target2d = jnp.pad(target2d, ((0, 0), (0, n_pad - n)))

    if reduction == "mean":
        scale = 1.0 / n
    elif reduction == "sum":
        scale = 1.0
    else:
        # TODO(synk): reduction='none' (per-sample (N,1) output) not implemented.
        raise NotImplementedError(f"reduction={reduction!r}")

    has_alpha = alpha is not None
    inputs = [predict_t, target2d]
    in_specs = [
        pl.BlockSpec((c, tile_n), lambda s, t: (0, s * tiles_per_split + t)),
        pl.BlockSpec((1, tile_n), lambda s, t: (0, s * tiles_per_split + t)),
    ]
    if has_alpha:
        alpha_col = jnp.asarray(alpha, jnp.float32).reshape(c, 1)
        inputs.append(alpha_col)
        in_specs.append(pl.BlockSpec((c, 1), lambda s, t: (0, 0)))

    kernel = functools.partial(
        _focal_loss_kernel,
        gamma=float(gamma), n_valid=n, tile_n=tile_n,
        tiles_per_split=tiles_per_split, needs_mask=needs_mask,
        has_alpha=has_alpha)

    # Each split writes its partial sum (lane-broadcast) to its own lane-dense
    # 128-wide output block; cross-split sum + mean/sum scaling is cheap XLA.
    out = pl.pallas_call(
        kernel,
        out_shape=jax.ShapeDtypeStruct((1, 128 * num_splits), jnp.float32),
        grid=(num_splits, tiles_per_split),
        in_specs=in_specs,
        out_specs=pl.BlockSpec((1, 128), lambda s, t: (0, s)),
        scratch_shapes=[pltpu.VMEM((1, 1), jnp.float32)],
        compiler_params=pltpu.CompilerParams(
            dimension_semantics=("parallel", "arbitrary"),
            vmem_limit_bytes=32 * 1024 * 1024),
    )(*inputs)
    partials = out[0, ::128]                      # one scalar per split
    return jnp.sum(partials) * jnp.float32(scale)


def _reference(predict, target, alpha_vec, gamma=2.0, reduction="mean"):
    pt = jax.nn.softmax(predict.astype(jnp.float32), axis=1)
    mask = jax.nn.one_hot(target, predict.shape[1], dtype=jnp.float32)
    probs = jnp.sum(pt * mask, axis=1, keepdims=True)
    a = alpha_vec[target].reshape(-1, 1)
    loss = -a * jnp.power(1.0 - probs, gamma) * jnp.log(probs)
    return jnp.mean(loss) if reduction == "mean" else jnp.sum(loss)


if __name__ == "__main__":
    class_num = 4
    gamma = 2.0

    key = jax.random.PRNGKey(0)
    k1, k2, k3, k4, k5 = jax.random.split(key, 5)

    # --- Small case (single tile), module default alpha=None (ones). ---
    batch = 8
    predict = jax.random.normal(k1, (batch, class_num), dtype=jnp.float32)
    target = jax.random.randint(k2, (batch,), 0, class_num, dtype=jnp.int32)

    loss = multi_ce_focal_loss(predict, target, alpha=None, gamma=gamma)
    loss = jax.block_until_ready(loss)
    ref = _reference(predict, target, jnp.ones((class_num,), jnp.float32), gamma)
    assert jnp.allclose(loss, ref, atol=1e-5, rtol=1e-5), (loss, ref)

    # --- Small case, explicit per-class alpha (as in the module). ---
    alpha = jax.random.uniform(k3, (class_num, 1), dtype=jnp.float32) + 0.5
    loss2 = multi_ce_focal_loss(predict, target, alpha=alpha, gamma=gamma)
    loss2 = jax.block_until_ready(loss2)
    ref2 = _reference(predict, target, alpha.reshape(-1), gamma)
    assert jnp.allclose(loss2, ref2, atol=1e-5, rtol=1e-5), (loss2, ref2)

    # --- Multi-tile / two-split path (forced small block) with padding mask. ---
    batch3 = 300
    predict3 = jax.random.normal(k4, (batch3, class_num), dtype=jnp.float32)
    target3 = jax.random.randint(k5, (batch3,), 0, class_num, dtype=jnp.int32)
    loss3 = multi_ce_focal_loss(predict3, target3, alpha=alpha, gamma=gamma,
                                reduction="mean", block_n=128)
    loss3 = jax.block_until_ready(loss3)
    ref3 = _reference(predict3, target3, alpha.reshape(-1), gamma, "mean")
    assert jnp.allclose(loss3, ref3, atol=1e-5, rtol=1e-5), (loss3, ref3)

    loss4 = multi_ce_focal_loss(predict3, target3, alpha=alpha, gamma=gamma,
                                reduction="sum", block_n=128)
    loss4 = jax.block_until_ready(loss4)
    ref4 = _reference(predict3, target3, alpha.reshape(-1), gamma, "sum")
    assert jnp.allclose(loss4, ref4, atol=1e-4, rtol=1e-5), (loss4, ref4)

    print("KERNEL_OK")
</pallas_src>

<mosaic_0001>
module attributes {stable_mosaic.version = 11 : i64} {
  func.func @_focal_loss_kernel(%arg0: i32, %arg1: i32, %arg2: memref<4x128xf32, #tpu.memory_space<vmem>>, %arg3: memref<1x128xi32, #tpu.memory_space<vmem>>, %arg4: memref<1x128xf32, #tpu.memory_space<vmem>>, %arg5: memref<1x1xf32, #tpu.memory_space<vmem>>) attributes {dimension_semantics = [#tpu.dimension_semantics<parallel>, #tpu.dimension_semantics<arbitrary>], iteration_bounds = array<i64: 1, 1>, scalar_prefetch = 0 : i64, scratch_operands = 1 : i64, tpu.core_type = #tpu.core_type<tc>, window_params = [{transform_indices = @transform_0, window_bounds = array<i64: 4, 128>}, {transform_indices = @transform_1, window_bounds = array<i64: 1, 128>}, {transform_indices = @transform_2, window_bounds = array<i64: 1, 128>}]} {
    %c0_i32 = arith.constant 0 : i32
    %0 = arith.cmpi eq, %arg1, %c0_i32 : i32
    %1 = arith.extui %0 : i1 to i32
    %c0_i32_0 = arith.constant 0 : i32
    %2 = arith.cmpi ne, %1, %c0_i32_0 : i32
    scf.if %2 {
      %cst_16 = arith.constant 0.000000e+00 : f32
      %48 = vector.broadcast %cst_16 : f32 to vector<1x1xf32>
      %c0_17 = arith.constant 0 : index
      %c0_18 = arith.constant 0 : index
      %49 = vector.load %arg5[%c0_17, %c0_18] : memref<1x1xf32, #tpu.memory_space<vmem>>, vector<1x1xf32>
      tpu.vector_store %arg5[%c0_17, %c0_18], %48 {strides = array<i32>} : memref<1x1xf32, #tpu.memory_space<vmem>>, vector<1x1xf32>,
    } else {
    }
    %c0 = arith.constant 0 : index
    %c0_1 = arith.constant 0 : index
    %3 = vector.load %arg2[%c0, %c0_1] : memref<4x128xf32, #tpu.memory_space<vmem>>, vector<4x128xf32>
    %c0_2 = arith.constant 0 : index
    %c0_3 = arith.constant 0 : index
    %4 = vector.load %arg3[%c0_2, %c0_3] : memref<1x128xi32, #tpu.memory_space<vmem>>, vector<1x128xi32>
    %5 = tpu.iota {dimensions = array<i32: 0>} : vector<4x128xi32>
    %6 = vector.broadcast %4 : vector<1x128xi32> to vector<4x128xi32>
    %7 = arith.cmpi eq, %5, %6 : vector<4x128xi32>
    %8 = arith.extui %7 : vector<4x128xi1> to vector<4x128xi32>
    %9 = arith.sitofp %8 : vector<4x128xi32> to vector<4x128xf32>
    %cst = arith.constant dense<0xFF800000> : vector<128xf32>
    %10 = vector.multi_reduction <maximumf>, %3, %cst [0] : vector<4x128xf32> to vector<128xf32>
    %11 = vector.shape_cast %10 : vector<128xf32> to vector<1x128xf32>
    %12 = vector.broadcast %11 : vector<1x128xf32> to vector<4x128xf32>
    %13 = arith.subf %3, %12 : vector<4x128xf32>
    %14 = math.exp %13 : vector<4x128xf32>
    %cst_4 = arith.constant dense<0.000000e+00> : vector<128xf32>
    %15 = vector.multi_reduction <add>, %14, %cst_4 [0] : vector<4x128xf32> to vector<128xf32>
    %16 = vector.shape_cast %15 : vector<128xf32> to vector<1x128xf32>
    %17 = math.log %16 : vector<1x128xf32>
    %18 = arith.addf %11, %17 : vector<1x128xf32>
    %19 = arith.mulf %3, %9 : vector<4x128xf32>
    %cst_5 = arith.constant dense<0.000000e+00> : vector<128xf32>
    %20 = vector.multi_reduction <add>, %19, %cst_5 [0] : vector<4x128xf32> to vector<128xf32>
    %21 = vector.shape_cast %20 : vector<128xf32> to vector<1x128xf32>
    %22 = arith.subf %21, %18 : vector<1x128xf32>
    %23 = math.exp %22 : vector<1x128xf32>
    %cst_6 = arith.constant 1.000000e+00 : f32
    %24 = vector.broadcast %cst_6 : f32 to vector<1x128xf32>
    %25 = arith.subf %24, %23 : vector<1x128xf32>
    %26 = arith.mulf %25, %25 : vector<1x128xf32>
    %cst_7 = arith.constant 0.000000e+00 : f32
    %27 = vector.broadcast %cst_7 : f32 to vector<1x128xf32>
    %28 = arith.subf %27, %26 : vector<1x128xf32>
    %29 = arith.mulf %28, %22 : vector<1x128xf32>
    %30 = tpu.iota {dimensions = array<i32: 1>} : vector<1x128xi32>
    %c1_i32 = arith.constant 1 : i32
    %31 = arith.muli %arg0, %c1_i32 : i32
    %32 = arith.addi %31, %arg1 : i32
    %c128_i32 = arith.constant 128 : i32
    %33 = arith.muli %32, %c128_i32 : i32
    %34 = vector.broadcast %33 : i32 to vector<1x128xi32>
    %35 = arith.addi %34, %30 : vector<1x128xi32>
    %c8_i32 = arith.constant 8 : i32
    %36 = vector.broadcast %c8_i32 : i32 to vector<1x128xi32>
    %37 = arith.cmpi slt, %35, %36 : vector<1x128xi32>
    %cst_8 = arith.constant 0.000000e+00 : f32
    %38 = vector.broadcast %cst_8 : f32 to vector<1x128xf32>
    %39 = arith.select %37, %29, %38 : vector<1x128xi1>, vector<1x128xf32>
    %c0_9 = arith.constant 0 : index
    %c0_10 = arith.constant 0 : index
    %40 = vector.load %arg5[%c0_9, %c0_10] : memref<1x1xf32, #tpu.memory_space<vmem>>, vector<1x1xf32>
    %cst_11 = arith.constant dense<0.000000e+00> : vector<1xf32>
    %41 = vector.multi_reduction <add>, %39, %cst_11 [1] : vector<1x128xf32> to vector<1xf32>
    %42 = vector.shape_cast %41 : vector<1xf32> to vector<1x1xf32>
    %43 = arith.addf %40, %42 : vector<1x1xf32>
    %c0_12 = arith.constant 0 : index
    %c0_13 = arith.constant 0 : index
    %44 = vector.load %arg5[%c0_12, %c0_13] : memref<1x1xf32, #tpu.memory_space<vmem>>, vector<1x1xf32>
    tpu.vector_store %arg5[%c0_12, %c0_13], %43 {strides = array<i32>} : memref<1x1xf32, #tpu.memory_space<vmem>>, vector<1x1xf32>,
    %c0_i32_14 = arith.constant 0 : i32
    %45 = arith.cmpi eq, %arg1, %c0_i32_14 : i32
    %46 = arith.extui %45 : i1 to i32
    %c0_i32_15 = arith.constant 0 : i32
    %47 = arith.cmpi ne, %46, %c0_i32_15 : i32
    scf.if %47 {
      %c0_16 = arith.constant 0 : index
      %c0_17 = arith.constant 0 : index
      %48 = vector.load %arg5[%c0_16, %c0_17] : memref<1x1xf32, #tpu.memory_space<vmem>>, vector<1x1xf32>
      %49 = vector.shape_cast %48 : vector<1x1xf32> to vector<1x1xf32>
      %50 = vector.broadcast %49 : vector<1x1xf32> to vector<1x128xf32>
      %c0_18 = arith.constant 0 : index
      %c0_19 = arith.constant 0 : index
      %51 = vector.load %arg4[%c0_18, %c0_19] : memref<1x128xf32, #tpu.memory_space<vmem>>, vector<1x128xf32>
      tpu.vector_store %arg4[%c0_18, %c0_19], %50 {strides = array<i32>} : memref<1x128xf32, #tpu.memory_space<vmem>>, vector<1x128xf32>,
    } else {
    }
    return
  }
  func.func @transform_0(%arg0: i32, %arg1: i32) -> (i32, i32) {
    %c1_i32 = arith.constant 1 : i32
    %0 = arith.muli %arg0, %c1_i32 : i32
    %1 = arith.addi %0, %arg1 : i32
    %c0_i32 = arith.constant 0 : i32
    %c0_i32_0 = arith.constant 0 : i32
    return %c0_i32, %1 : i32, i32
  }
  func.func @transform_1(%arg0: i32, %arg1: i32) -> (i32, i32) {
    %c1_i32 = arith.constant 1 : i32
    %0 = arith.muli %arg0, %c1_i32 : i32
    %1 = arith.addi %0, %arg1 : i32
    %c0_i32 = arith.constant 0 : i32
    %c0_i32_0 = arith.constant 0 : i32
    return %c0_i32, %1 : i32, i32
  }
  func.func @transform_2(%arg0: i32, %arg1: i32) -> (i32, i32) {
    %c0_i32 = arith.constant 0 : i32
    %c0_i32_0 = arith.constant 0 : i32
    return %c0_i32, %arg0 : i32, i32
  }
}

</mosaic_0001>

<bundles_post_ra>
// kernel: tpu_custom_call.1
= control target key start
LH: loop header
LB: loop body
LE: loop exit
PB: predicated region body
PF: predicated region fallthrough
CT: control target
= control target key end

     0   :  { %7 = vsyncpa [#allocation4], 0  ;;  %s266_s0 = inlined_call_operand.hbm [shape: f32[4,128], index: 0, kind: input, shape index: {}]   ;;  %s267_s1 = inlined_call_operand.hbm [shape: s32[1,128], index: 1, kind: input, shape index: {}]   ;;  %s268_s2 = inlined_call_operand.hbm [shape: f32[1,128], index: 2, kind: output, shape index: {}]  }
   0x1   :  { %8 = vsyncpa [#allocation7], 0 }
   0x2   :  { %9 = vsyncpa [#allocation5], 0  ;;  %s18_s11 = sshll.u32 %s266_s0, 4  ;;  %s232_s12 = smov [#allocation3]   ;;  %s19_s11 = int_to_ptr.hbm [resolvable:$true] %s18_s11 }
   0x3   :  { %s20_s13 = sshll.u32 %s232_s12, 4  ;;  %s31_s16 = sshll.u32 %s267_s1, 4  ;;  %s21_s13 = int_to_ptr.vmem [resolvable:$true] %s20_s13  ;;  %s32_s16 = int_to_ptr.hbm [resolvable:$true] %s31_s16 }
   0x4   :  { %23 = dma.hbm_to_vmem [thread:$0]  %s19_s11, 64, %s21_s13, [#allocation4]  }
   0x5   :  { %s233_s17 = smov [#allocation6]  }
   0x6   :  { %s33_s18 = sshll.u32 %s233_s17, 4  ;;  %s34_s18 = int_to_ptr.vmem [resolvable:$true] %s33_s18 }
   0x7   :  { %36 = dma.hbm_to_vmem [thread:$0]  %s32_s16, 16, %s34_s18, [#allocation7]  }
   0x8   :  { %226 = dma.done.wait [#allocation4], 64  }
   0x9   :  { %227 = vsyncadd [#allocation4], 4294967232 }
   0xa   :  { %228 = dma.done.wait [#allocation7], 16  }
   0xb   :  { %229 = vsyncadd [#allocation7], 4294967280  ;;  %vm51_vm0 = vcmask 0   ;;  %v234_v0 = vmov 0.0   ;;  %vm61_vm1 = vcmask 1043456   ;;  %v55_v4 = vlaneseq  ;;  %s236_s0 = smov [#allocation8]  }
   0xc   :  { %52 = vst.msk [vmem:[#allocation2] sm:$0x1] %vm51_vm0, %v234_v0  ;;  %v53_v1 = vld [vmem:[#allocation3] sm:$0xf]  ;;  %v147_v8 = vld [vmem:[#allocation6] ss:$0 sm:$0xff] }
   0xd   :  { %v62_v2 = vsel %vm61_vm1, %v53_v1, -inf  ;;  %v56_v7 = vshrl.u32 %v55_v4, 7  ;;  %v98_v38 = vand.u32 127, %v55_v4  ;;  %v235_v43 = vmov 0   ;;  %s127_s1 = sshll.u32 %s236_s0, 4  ;;  %s129_s21 = sshll.u32 %s268_s2, 4  ;;  %s128_s1 = int_to_ptr.vmem [resolvable:$true] %s127_s1  ;;  %s130_s21 = int_to_ptr.hbm [resolvable:$true] %s129_s21 }
   0xe   :  { %v63_v3 = vrot.slane %v62_v2, 4  ;;  %146 = vset.pattern.permute.xlu0 %v235_v43 }
   0xf   :  { %vm58_vm2 = vcmp.eq.s32.totalorder %v56_v7, %v147_v8  ;;  %vm103_vm3 = vcmp.lt.s32.totalorder %v98_v38, 8 }
  0x10   :  { %v64_v5 = vmax.f32 %v62_v2, %v63_v3  ;;  %v140_v13 = vsel %vm58_vm2, 1.0, %v234_v0 }
  0x11   :  { %v82_v15 = vmul.f32 %v140_v13, %v53_v1 }
  0x12   :  { %v65_v6 = vrot.slane %v64_v5, 2 }
  0x13   :  { %v83_v16 = vsel %vm61_vm1, %v82_v15, 0.0  ;;  %v105_v44 = vld [vmem:[#allocation2] sm:$0x1] }
  0x14   :  { %v66_v9 = vmax.f32 %v64_v5, %v65_v6  ;;  %v84_v19 = vrot.slane %v83_v16, 4 }
  0x16   :  { %v67_v10 = vrot.slane %v66_v9, 1  ;;  %v85_v22 = vadd.f32 %v84_v19, %v83_v16 }
  0x18   :  { %v68_v11 = vmax.f32 %v66_v9, %v67_v10  ;;  %v86_v25 = vrot.slane %v85_v22, 2 }
  0x1a   :  { %v69_v12 = vsub.f32 %v53_v1, %v68_v11  ;;  %v87_v28 = vadd.f32 %v86_v25, %v85_v22 }
  0x1c   :  { %v70_v14 = vmul.f32 1.442695, %v69_v12  ;;  %v88_v29 = vrot.slane %v87_v28, 1 }
  0x1e   :  { %148 = vpow2.f32 %v70_v14  ;;  %v89_v32 = vadd.f32 %v88_v29, %v87_v28 }
  0x24   :  { %v149_v17 = vpop.eup %148 }
  0x25   :  { %v72_v18 = vsel %vm61_vm1, %v149_v17, 0.0 }
  0x26   :  { %v73_v20 = vrot.slane %v72_v18, 4 }
  0x28   :  { %v74_v21 = vadd.f32 %v73_v20, %v72_v18 }
  0x2a   :  { %v75_v23 = vrot.slane %v74_v21, 2 }
  0x2c   :  { %v76_v24 = vadd.f32 %v75_v23, %v74_v21 }
  0x2e   :  { %v77_v26 = vrot.slane %v76_v24, 1 }
  0x30   :  { %v78_v27 = vadd.f32 %v77_v26, %v76_v24 }
  0x32   :  { %150 = vlog2.f32 %v78_v27 }
  0x38   :  { %v151_v30 = vpop.eup %150 }
  0x39   :  { %v80_v31 = vmul.f32 0.6931472, %v151_v30 }
  0x3b   :  { %v81_v33 = vadd.f32 %v80_v31, %v68_v11 }
  0x3d   :  { %v90_v34 = vsub.f32 %v89_v32, %v81_v33 }
  0x3f   :  { %v91_v35 = vmul.f32 1.442695, %v90_v34 }
  0x41   :  { %152 = vpow2.f32 %v91_v35 }
  0x47   :  { %v153_v36 = vpop.eup %152 }
  0x48   :  { %v93_v37 = vsub.f32 1.0, %v153_v36 }
  0x4a   :  { %v94_v39 = vmul.f32 %v93_v37, %v93_v37 }
  0x4c   :  { %v95_v40 = vsub.f32 0.0, %v94_v39 }
  0x4e   :  { %v96_v41 = vmul.f32 %v95_v40, %v90_v34 }
  0x50   :  { %v104_v42 = vsel %vm103_vm3, %v96_v41, 0.0 }
  0x51   :  { %106 = vadd.xlane.f32.xlu0 %v104_v42 }
  0xc4   :  { %v107_v45 = vpop.xlane.xlu0 %106 }
  0xc5   :  { %v108_v46 = vadd.f32 %v107_v45, %v105_v44 }
  0xc7   :  { %110 = vst.msk [vmem:[#allocation2] sm:$0x1] %vm51_vm0, %v108_v46 }
  0xce   :  { %v114_v47 = vld [vmem:[#allocation2] sm:$0x1] }
  0xcf   :  { %117 = vperm.xlu0 %146, %v114_v47  }
 0x141   :  { %v118_v48 = vpop.permute.xlu0 %117 }
 0x142   :  { %v120_v49 = vperm.slane %v118_v48, 0 }
 0x144   :  { %121 = vst [vmem:[#allocation8] sm:$0x1] %v120_v49 }
 0x145   :  { %132 = dma.vmem_to_hbm [thread:$0]  %s128_s1, 16, %s130_s21, [#allocation5]  }
 0x146   :  { %230 = dma.done.wait [#allocation5], 16  }
 0x147   :  { %231 = vsyncadd [#allocation5], 4294967280 }
 0x148   :  { %137 = vsyncpa [#allocation4], 1 }
 0x149   :  { %138 = vsyncpa [#allocation7], 1 }
 0x14a   :  { %139 = vsyncpa [#allocation5], 1 }

</bundles_post_ra>
